<compile_context>
chip_gen: v5e
topology: v5e:2x2
jax: 0.10.0
libtpu: 0.0.40
codegen_flags: <defaults>
</compile_context>

<pallas_src>
import math

import jax
import jax.numpy as jnp
from jax import lax
from jax.experimental import pallas as pl
from jax.experimental.pallas import tpu as pltpu

_LANE = 128
_SUBLANE = 8

# CubeEmbed.proj2 is fixed in the module: Conv3d(k=(5,3,3), s=(5,2,2), p=(0,1,1)).
_PROJ2_KERNEL = (5, 3, 3)
_PROJ2_STRIDE = (5, 2, 2)
_PROJ2_PADDING = (0, 1, 1)


def _round_up(a, b):
    return ((a + b - 1) // b) * b


# ---------------------------------------------------------------------------
# Pallas kernel: (Cout_p, K) @ (K, TL) GEMM + bias + ReLU, f32 accumulation.
# ---------------------------------------------------------------------------
def _gemm_bias_relu_kernel(p_ref, w_ref, b_ref, o_ref):
    # p_ref: (K, TL)      bf16 patch tile (token axis on lanes)
    # w_ref: (Cout_p, K)  bf16 weights (resident across the grid)
    # b_ref: (Cout_p, 1)  f32 bias
    # o_ref: (Cout_p, TL) f32 output tile
    acc = jnp.dot(w_ref[...], p_ref[...], preferred_element_type=jnp.float32)
    acc = acc + b_ref[...]
    o_ref[...] = jnp.maximum(acc, 0.0).astype(o_ref.dtype)


# ---------------------------------------------------------------------------
# Wrapper-side glue.
# ---------------------------------------------------------------------------
def _im2col_transposed(x_bf16, kernel, stride, padding):
    """(N, Cin, D, H, W) bf16 -> (N, K, L) bf16, K = Cin*kD*kH*kW, L = Do*Ho*Wo.

    Single bf16 materialization (pad + strided window slices + stack, fused by
    XLA).  K is ordered (Cin, kD, kH, kW) to match weight.reshape(Cout, -1).
    """
    N, Cin, D, H, W = x_bf16.shape
    kD, kH, kW = kernel
    sD, sH, sW = stride
    pD, pH, pW = padding
    Do = (D + 2 * pD - kD) // sD + 1
    Ho = (H + 2 * pH - kH) // sH + 1
    Wo = (W + 2 * pW - kW) // sW + 1
    xp = jnp.pad(x_bf16, ((0, 0), (0, 0), (pD, pD), (pH, pH), (pW, pW)))
    cols = []
    for dk in range(kD):
        for hk in range(kH):
            for wk in range(kW):
                cols.append(
                    xp[:, :,
                       dk:dk + (Do - 1) * sD + 1:sD,
                       hk:hk + (Ho - 1) * sH + 1:sH,
                       wk:wk + (Wo - 1) * sW + 1:sW])
    p = jnp.stack(cols, axis=2)                 # (N, Cin, kD*kH*kW, Do, Ho, Wo)
    p = p.reshape(N, Cin * kD * kH * kW, Do * Ho * Wo)
    return p, (Do, Ho, Wo)


def prepare_conv_params(weight, bias):
    """One-time packing of Conv3d params (hoisted out of the per-call path).

    weight (Cout, Cin, kD, kH, kW) f32 -> (Cout_p, K) bf16, Cout_p = ceil8(Cout)
    bias   (Cout,) f32               -> (Cout_p, 1) f32
    """
    Cout = weight.shape[0]
    K = math.prod(weight.shape[1:])
    Cout_p = _round_up(Cout, _SUBLANE)
    w2d = jnp.pad(weight.reshape(Cout, K), ((0, Cout_p - Cout), (0, 0)))
    w2d = w2d.astype(jnp.bfloat16)
    b2d = jnp.pad(bias.astype(jnp.float32).reshape(Cout, 1),
                  ((0, Cout_p - Cout), (0, 0)))
    return w2d, b2d, Cout


def _pick_lane_tile(K, L, cout_p, *, tl_max=2048, vmem_budget=16 * 1024 * 1024):
    """Largest lane tile (multiple of 128) fitting a double-buffered VMEM budget."""
    if L < _LANE:
        return L                                  # single full-extent block
    w_bytes = 2 * cout_p * _round_up(K, _LANE) * 2   # resident weights (upper bound)
    per_lane = 2 * (K * 2) + 2 * (cout_p * 4)        # patch tile (bf16) + out tile (f32), x2 buffers
    tl_fit = max(_LANE, ((vmem_budget - w_bytes) // per_lane) // _LANE * _LANE)
    return int(min(tl_max, (L // _LANE) * _LANE, tl_fit))


def conv3d_bias_relu(x, w2d, b2d, cout, kernel, stride, padding, *, tl_max=2048):
    """ReLU(Conv3d(x) + bias) via im2col + Pallas GEMM.  x: (N, Cin, D, H, W)."""
    patches, (Do, Ho, Wo) = _im2col_transposed(
        x.astype(jnp.bfloat16), kernel, stride, padding)
    N, K, L = patches.shape
    Cout_p = w2d.shape[0]

    tl = _pick_lane_tile(K, L, Cout_p, tl_max=tl_max)
    grid = (N, pl.cdiv(L, tl))

    cost = pl.CostEstimate(
        flops=2 * N * L * K * Cout_p,
        transcendentals=0,
        bytes_accessed=int(patches.size * 2 + w2d.size * 2 + b2d.size * 4
                           + N * Cout_p * L * 4))

    out = pl.pallas_call(
        _gemm_bias_relu_kernel,
        out_shape=jax.ShapeDtypeStruct((N, Cout_p, L), jnp.float32),
        grid=grid,
        in_specs=[
            pl.BlockSpec((None, K, tl), lambda n, j: (n, 0, j)),   # patches (batch squeezed)
            pl.BlockSpec((Cout_p, K), lambda n, j: (0, 0)),        # weights (resident)
            pl.BlockSpec((Cout_p, 1), lambda n, j: (0, 0)),        # bias (resident)
        ],
        out_specs=pl.BlockSpec((None, Cout_p, tl), lambda n, j: (n, 0, j)),
        compiler_params=pltpu.CompilerParams(
            dimension_semantics=("parallel", "parallel"),
            vmem_limit_bytes=32 * 1024 * 1024),
        cost_estimate=cost,
    )(patches, w2d, b2d)

    # Cout_p is a multiple of 8 only; slice off padded channels (no-op if equal)
    # and reshape back to NCDHW — no transpose needed in this orientation.
    return out[:, :cout, :].reshape(N, cout, Do, Ho, Wo)


def make_cube_embed(w1, b1, w2, b2, *, kernel, stride, padding):
    """Build CubeEmbed.forward: x -> relu(conv2(relu(conv1(x)))), returns (y, y.shape)."""
    w1p, b1p, c1 = prepare_conv_params(w1, b1)
    w2p, b2p, c2 = prepare_conv_params(w2, b2)

    @jax.jit
    def _fwd(x):
        y = conv3d_bias_relu(x, w1p, b1p, c1, kernel, stride, padding)
        y = conv3d_bias_relu(y, w2p, b2p, c2,
                             _PROJ2_KERNEL, _PROJ2_STRIDE, _PROJ2_PADDING)
        return y

    def forward(x):
        y = _fwd(x)
        return y, tuple(y.shape)

    return forward


if __name__ == "__main__":
    # MViT builds: patch_embed = CubeEmbed(dim_out=EMBED_DIM, kernel=(4,4,4),
    # stride=(2,4,4), padding=(1,0,0)); input is headmaps.unsqueeze(1) -> Cin=1.
    dim_in, embed_dim = 1, 32
    k1, s1, p1 = (4, 4, 4), (2, 4, 4), (1, 0, 0)
    N, D, H, W = 2, 20, 16, 16

    key = jax.random.PRNGKey(0)
    kx, kw1, kb1, kw2, kb2 = jax.random.split(key, 5)
    x = jax.random.normal(kx, (N, dim_in, D, H, W), dtype=jnp.float32)

    def conv_init(kw, kb, cout, cin, kern):
        fan_in = cin * kern[0] * kern[1] * kern[2]
        bound = 1.0 / math.sqrt(fan_in)
        w = jax.random.uniform(kw, (cout, cin) + kern, minval=-bound,
                               maxval=bound, dtype=jnp.float32)
        b = jax.random.uniform(kb, (cout,), minval=-bound, maxval=bound,
                               dtype=jnp.float32)
        return w, b

    w1, b1 = conv_init(kw1, kb1, embed_dim, dim_in, k1)
    w2, b2 = conv_init(kw2, kb2, embed_dim, embed_dim, _PROJ2_KERNEL)

    forward = make_cube_embed(w1, b1, w2, b2, kernel=k1, stride=s1, padding=p1)
    y, y_shape = forward(x)
    y = jax.block_until_ready(y)

    # conv1: (2,1,20,16,16) -> (2,32,10,4,4); conv2 -> (2,32,2,2,2)
    assert y_shape == (N, embed_dim, 2, 2, 2), y_shape

    # Reference: f32 Conv3d + bias + ReLU, twice (CubeEmbed.forward semantics).
    def ref_conv(xin, w, b, stride, padding):
        r = lax.conv_general_dilated(
            xin, w, window_strides=stride,
            padding=[(padding[0], padding[0]), (padding[1], padding[1]),
                     (padding[2], padding[2])],
            dimension_numbers=("NCDHW", "OIDHW", "NCDHW"))
        return jnp.maximum(r + b.reshape(1, -1, 1, 1, 1), 0.0)

    ref = ref_conv(ref_conv(x, w1, b1, s1, p1), w2, b2, _PROJ2_STRIDE, _PROJ2_PADDING)
    max_err = float(jnp.max(jnp.abs(y - ref)))
    assert jnp.allclose(y, ref, atol=3e-2, rtol=3e-2), max_err

    print("KERNEL_OK")
</pallas_src>

<mosaic_0001>
module attributes {stable_mosaic.version = 11 : i64} {
  func.func @_gemm_bias_relu_kernel(%arg0: i32, %arg1: i32, %arg2: memref<1x64x128xbf16, #tpu.memory_space<vmem>>, %arg3: memref<32x64xbf16, #tpu.memory_space<vmem>>, %arg4: memref<32x1xf32, #tpu.memory_space<vmem>>, %arg5: memref<1x32x128xf32, #tpu.memory_space<vmem>>) attributes {dimension_semantics = [#tpu.dimension_semantics<parallel>, #tpu.dimension_semantics<parallel>], iteration_bounds = array<i64: 2, 2>, scalar_prefetch = 0 : i64, scratch_operands = 0 : i64, tpu.core_type = #tpu.core_type<tc>, window_params = [{transform_indices = @transform_0, window_bounds = array<i64: 1, 64, 128>}, {pipeline_mode = #tpu.pipeline_mode<synchronous>, transform_indices = @transform_1, window_bounds = array<i64: 32, 64>}, {pipeline_mode = #tpu.pipeline_mode<synchronous>, transform_indices = @transform_2, window_bounds = array<i64: 32, 1>}, {transform_indices = @transform_3, window_bounds = array<i64: 1, 32, 128>}]} {
    %c0 = arith.constant 0 : index
    %c0_0 = arith.constant 0 : index
    %0 = vector.load %arg3[%c0, %c0_0] : memref<32x64xbf16, #tpu.memory_space<vmem>>, vector<32x64xbf16>
    %c0_1 = arith.constant 0 : index
    %c0_2 = arith.constant 0 : index
    %c0_3 = arith.constant 0 : index
    %1 = vector.load %arg2[%c0_1, %c0_2, %c0_3] : memref<1x64x128xbf16, #tpu.memory_space<vmem>>, vector<1x64x128xbf16>
    %2 = vector.shape_cast %1 : vector<1x64x128xbf16> to vector<64x128xbf16>
    %cst = arith.constant dense<0.000000e+00> : vector<32x128xf32>
    %3 = tpu.matmul %0, %2, %cst {dimension_numbers = #tpu.dot_dimension_numbers<[1], [0], [0], [1], [0, 0, 1, 1], [], []>} : vector<32x64xbf16>, vector<64x128xbf16>, vector<32x128xf32> -> vector<32x128xf32>
    %c0_4 = arith.constant 0 : index
    %c0_5 = arith.constant 0 : index
    %4 = vector.load %arg4[%c0_4, %c0_5] : memref<32x1xf32, #tpu.memory_space<vmem>>, vector<32x1xf32>
    %5 = vector.broadcast %4 : vector<32x1xf32> to vector<32x128xf32>
    %6 = arith.addf %3, %5 : vector<32x128xf32>
    %cst_6 = arith.constant 0.000000e+00 : f32
    %7 = vector.broadcast %cst_6 : f32 to vector<32x128xf32>
    %8 = arith.maximumf %6, %7 : vector<32x128xf32>
    %c0_7 = arith.constant 0 : index
    %c0_8 = arith.constant 0 : index
    %c0_9 = arith.constant 0 : index
    %9 = vector.load %arg5[%c0_7, %c0_8, %c0_9] : memref<1x32x128xf32, #tpu.memory_space<vmem>>, vector<1x32x128xf32>
    %10 = vector.shape_cast %9 : vector<1x32x128xf32> to vector<32x128xf32>
    %11 = vector.shape_cast %8 : vector<32x128xf32> to vector<1x32x128xf32>
    tpu.vector_store %arg5[%c0_7, %c0_8, %c0_9], %11 {strides = array<i32>} : memref<1x32x128xf32, #tpu.memory_space<vmem>>, vector<1x32x128xf32>,
    return
  }
  func.func @transform_0(%arg0: i32, %arg1: i32) -> (i32, i32, i32) {
    %c0_i32 = arith.constant 0 : i32
    %c0_i32_0 = arith.constant 0 : i32
    return %arg0, %c0_i32, %arg1 : i32, i32, i32
  }
  func.func @transform_1(%arg0: i32, %arg1: i32) -> (i32, i32) {
    %c0_i32 = arith.constant 0 : i32
    %c0_i32_0 = arith.constant 0 : i32
    %c0_i32_1 = arith.constant 0 : i32
    return %c0_i32, %c0_i32_0 : i32, i32
  }
  func.func @transform_2(%arg0: i32, %arg1: i32) -> (i32, i32) {
    %c0_i32 = arith.constant 0 : i32
    %c0_i32_0 = arith.constant 0 : i32
    %c0_i32_1 = arith.constant 0 : i32
    return %c0_i32, %c0_i32_0 : i32, i32
  }
  func.func @transform_3(%arg0: i32, %arg1: i32) -> (i32, i32, i32) {
    %c0_i32 = arith.constant 0 : i32
    %c0_i32_0 = arith.constant 0 : i32
    return %arg0, %c0_i32, %arg1 : i32, i32, i32
  }
}

module attributes {stable_mosaic.version = 11 : i64} {
  func.func @_gemm_bias_relu_kernel(%arg0: i32, %arg1: i32, %arg2: memref<1x1440x8xbf16, #tpu.memory_space<vmem>>, %arg3: memref<32x1440xbf16, #tpu.memory_space<vmem>>, %arg4: memref<32x1xf32, #tpu.memory_space<vmem>>, %arg5: memref<1x32x8xf32, #tpu.memory_space<vmem>>) attributes {dimension_semantics = [#tpu.dimension_semantics<parallel>, #tpu.dimension_semantics<parallel>], iteration_bounds = array<i64: 2, 1>, scalar_prefetch = 0 : i64, scratch_operands = 0 : i64, tpu.core_type = #tpu.core_type<tc>, window_params = [{transform_indices = @transform_0, window_bounds = array<i64: 1, 1440, 8>}, {pipeline_mode = #tpu.pipeline_mode<synchronous>, transform_indices = @transform_1, window_bounds = array<i64: 32, 1440>}, {pipeline_mode = #tpu.pipeline_mode<synchronous>, transform_indices = @transform_2, window_bounds = array<i64: 32, 1>}, {transform_indices = @transform_3, window_bounds = array<i64: 1, 32, 8>}]} {
    %c0 = arith.constant 0 : index
    %c0_0 = arith.constant 0 : index
    %0 = vector.load %arg3[%c0, %c0_0] : memref<32x1440xbf16, #tpu.memory_space<vmem>>, vector<32x1440xbf16>
    %c0_1 = arith.constant 0 : index
    %c0_2 = arith.constant 0 : index
    %c0_3 = arith.constant 0 : index
    %1 = vector.load %arg2[%c0_1, %c0_2, %c0_3] : memref<1x1440x8xbf16, #tpu.memory_space<vmem>>, vector<1x1440x8xbf16>
    %2 = vector.shape_cast %1 : vector<1x1440x8xbf16> to vector<1440x8xbf16>
    %cst = arith.constant dense<0.000000e+00> : vector<32x8xf32>
    %3 = tpu.matmul %0, %2, %cst {dimension_numbers = #tpu.dot_dimension_numbers<[1], [0], [0], [1], [0, 0, 1, 1], [], []>} : vector<32x1440xbf16>, vector<1440x8xbf16>, vector<32x8xf32> -> vector<32x8xf32>
    %c0_4 = arith.constant 0 : index
    %c0_5 = arith.constant 0 : index
    %4 = vector.load %arg4[%c0_4, %c0_5] : memref<32x1xf32, #tpu.memory_space<vmem>>, vector<32x1xf32>
    %5 = vector.broadcast %4 : vector<32x1xf32> to vector<32x8xf32>
    %6 = arith.addf %3, %5 : vector<32x8xf32>
    %cst_6 = arith.constant 0.000000e+00 : f32
    %7 = vector.broadcast %cst_6 : f32 to vector<32x8xf32>
    %8 = arith.maximumf %6, %7 : vector<32x8xf32>
    %c0_7 = arith.constant 0 : index
    %c0_8 = arith.constant 0 : index
    %c0_9 = arith.constant 0 : index
    %9 = vector.load %arg5[%c0_7, %c0_8, %c0_9] : memref<1x32x8xf32, #tpu.memory_space<vmem>>, vector<1x32x8xf32>
    %10 = vector.shape_cast %9 : vector<1x32x8xf32> to vector<32x8xf32>
    %11 = vector.shape_cast %8 : vector<32x8xf32> to vector<1x32x8xf32>
    tpu.vector_store %arg5[%c0_7, %c0_8, %c0_9], %11 {strides = array<i32>} : memref<1x32x8xf32, #tpu.memory_space<vmem>>, vector<1x32x8xf32>,
    return
  }
  func.func @transform_0(%arg0: i32, %arg1: i32) -> (i32, i32, i32) {
    %c0_i32 = arith.constant 0 : i32
    %c0_i32_0 = arith.constant 0 : i32
    return %arg0, %c0_i32, %arg1 : i32, i32, i32
  }
  func.func @transform_1(%arg0: i32, %arg1: i32) -> (i32, i32) {
    %c0_i32 = arith.constant 0 : i32
    %c0_i32_0 = arith.constant 0 : i32
    %c0_i32_1 = arith.constant 0 : i32
    return %c0_i32, %c0_i32_0 : i32, i32
  }
  func.func @transform_2(%arg0: i32, %arg1: i32) -> (i32, i32) {
    %c0_i32 = arith.constant 0 : i32
    %c0_i32_0 = arith.constant 0 : i32
    %c0_i32_1 = arith.constant 0 : i32
    return %c0_i32, %c0_i32_0 : i32, i32
  }
  func.func @transform_3(%arg0: i32, %arg1: i32) -> (i32, i32, i32) {
    %c0_i32 = arith.constant 0 : i32
    %c0_i32_0 = arith.constant 0 : i32
    return %arg0, %c0_i32, %arg1 : i32, i32, i32
  }
}

</mosaic_0001>

<bundles_post_ra>
// kernel: _fwd.2
= control target key start
LH: loop header
LB: loop body
LE: loop exit
PB: predicated region body
PF: predicated region fallthrough
CT: control target
= control target key end

     0   :  { %s674_s12 = smov 0   ;;  %s676_s13 = smov 0   ;;  %s792_s0 = inlined_call_operand.vmem [shape: bf16[2,64,160], index: 0, kind: input, shape index: {}]   ;;  %s793_s1 = inlined_call_operand.vmem [shape: bf16[32,64], index: 1, kind: input, shape index: {}]   ;;  %s794_s2 = inlined_call_operand.vmem [shape: f32[32,1], index: 2, kind: input, shape index: {}]   ;;  %s795_s3 = inlined_call_operand.vmem [shape: f32[2,32,160], index: 3, kind: output, shape index: {}]  }
   0x1   :  { %s678_s14 = smov 0   ;;  %s680_s15 = smov 0  }
   0x2   :  { %s682_s16 = smov 0   ;;  %s684_s17 = smov 0  }
   0x3   :  { %s686_s18 = smov 0  }
   0x4 LB: > { %s22_s19 = sadd.s32 1, %s643_s16  ;;  %s25_s20 = sadd.s32 1, %s647_s17  ;;  %s651_s18 = sphi %s686_s18, %s13_s18   ;;  %s647_s17 = sphi %s684_s17, %s802_s17   ;;  %s643_s16 = sphi %s682_s16, %s801_s16   ;;  %s639_s15 = sphi %s680_s15, %s800_s15   ;;  %s635_s14 = sphi %s678_s14, %s799_s14   ;;  %s631_s13 = sphi %s676_s13, %s798_s13   ;;  %s627_s12 = sphi %s674_s12, %s797_s12  }
   0x5   : > { %p23_p0 = scmp.ge.s32.totalorder %s22_s19, 2  ;;  %s487_s21 = sadd.s32 4294967295, %s651_s18  }
   0x6   : > { %p41_p1 = scmp.ne.s32.totalorder %s631_s13, %s627_s12  ;;  %p42_p2 = scmp.eq.s32.totalorder %s651_s18, 0 }
   0x7   : > { %s804_s19 = smov (%p23_p0, %s22_s19), 0  ;;  %s806_s20 = smov (!%p23_p0, %s25_s20), %s647_s17 }
   0x8   : > { %p27_p3 = scmp.ge.s32.totalorder %s806_s20, 2  ;;  %p115_p4 = scmp.eq.s32.totalorder %s487_s21, 3 }
   0x9   : > { %s30_s22 = ssub.s32 %s643_s16, %s804_s19  ;;  %p43_p5 = por %p42_p2, %p41_p1 }
   0xa   : > { %s808_s20 = smov (%p27_p3, %s806_s20), 0  ;;  %p722_p6 = por %p115_p4, %p41_p1 }
   0xb   : > { %s29_s24 = ssub.s32 %s647_s17, %s808_s20  ;;  %s34_s26 = sadd.s32 1, %s631_s13 }
   0xc   : > { %s31_s25 = sor.u32 %s30_s22, %s29_s24  ;;  %p490_p8 = scmp.ge.s32.totalorder %s651_s18, 4 }
   0xd   : > { %p32_p7 = scmp.eq.s32.totalorder %s31_s25, 0 }
   0xe   : > { %143 = sbr.rel (%p490_p8) target bundleno = 33 (0x21), region = 24 }
   0xf   : > { %s730_s27 = scalar_select %p32_p7, %s631_s13, %s34_s26  }
  0x13   : > { %146 = sbr.rel (!%p43_p5) target bundleno = 33 (0x21), region = 28  ;;  %s148_s28 = sand.u32 (%p43_p5), 1, %s631_s13  }
  0x14   : > { %s492_s29 = sshll.u32 (%p43_p5), %s647_s17, 4  ;;  %s491_s30 = sshll.u32 (%p43_p5), %s148_s28, 5 }
  0x15   : > { %s152_s4 = sadd.s32 (%p43_p5), %s643_s16, %s492_s29  ;;  %s150_s9 = scalar_lea.vmem (%p43_p5), [#allocation2], %s491_s30 }
  0x16   : > { %s493_s5 = sshll.u32 (%p43_p5), %s152_s4, 2 }
  0x17   : > { %s154_s8 = scalar_lea.vmem (%p43_p5), %s792_s0, %s493_s5 }
  0x18   : > { %v171_v0 = vld [vmem:[%s154_s8] sm:$0xf]  ;;  %v173_v1 = vld [vmem:[%s154_s8 + $0x8] sm:$0xf]  ;;  %v175_v2 = vld [vmem:[%s154_s8 + $0x10] sm:$0xf] }
  0x19   : > { %172 = vst [vmem:[%s150_s9] sm:$0xf] %v171_v0  ;;  %v177_v3 = vld [vmem:[%s154_s8 + $0x18] sm:$0xf]  ;;  %v179_v4 = vld [vmem:[%s154_s8 + $0x20] sm:$0xf] }
  0x1a   : > { %174 = vst [vmem:[%s150_s9 + $0x4] sm:$0xf] %v173_v1  ;;  %v181_v5 = vld [vmem:[%s154_s8 + $0x28] sm:$0xf]  ;;  %v183_v6 = vld [vmem:[%s154_s8 + $0x30] sm:$0xf] }
  0x1b   : > { %176 = vst [vmem:[%s150_s9 + $0x8] sm:$0xf] %v175_v2  ;;  %v185_v7 = vld [vmem:[%s154_s8 + $0x38] sm:$0xf] }
  0x1c   : > { %178 = vst [vmem:[%s150_s9 + $0xc] sm:$0xf] %v177_v3 }
  0x1d   : > { %180 = vst [vmem:[%s150_s9 + $0x10] sm:$0xf] %v179_v4 }
  0x1e   : > { %182 = vst [vmem:[%s150_s9 + $0x14] sm:$0xf] %v181_v5 }
  0x1f   : > { %184 = vst [vmem:[%s150_s9 + $0x18] sm:$0xf] %v183_v6 }
  0x20   : > { %186 = vst [vmem:[%s150_s9 + $0x1c] sm:$0xf] %v185_v7 }
  0x21 PF: > { %p494_p9 = scmp.ge.s32.totalorder %s651_s18, 1  ;;  %p225_p10 = scmp.lt.s32.totalorder %s651_s18, 5 }
  0x23   : > { %p226_p11 = pnand %p494_p9, %p225_p10 }
  0x24   : > { %s232_s10 = sand.u32 (!%p226_p11), 1, %s627_s12  }
  0x25   : > { %229 = sbr.rel (%p226_p11) target bundleno = 208 (0xd0), region = 69  ;;  %s745_s22 = sshll.u32 (!%p226_p11), %s232_s10, 5 }
  0x26   : > { %s234_s26 = scalar_lea.vmem (!%p226_p11), [#allocation2], %s745_s22  ;;  %s253_s8 = scalar_lea.vmem (!%p226_p11), [#allocation3], %s745_s22 }
  0x2a   : > { %v269_v8 = vld [vmem:[%s794_s2 + $0x10] sm:$0xff]  ;;  %v653_v9 = vmov 0   ;;  %v267_v10 = vld [vmem:[%s794_s2] sm:$0xff]  ;;  %v533_v11 = vld [vmem:[%s234_s26 + $0x18] sm:$0xff]  ;;  %vm325_vm0 = vcmask 523264   ;;  %s524_s9 = sshll.u32 (%p722_p6), %s639_s15, 3 }
  0x2b   : > { %596 = vset.pattern.permute.xlu1 %v653_v9  ;;  %595 = vset.pattern.permute.xlu0 %v653_v9  ;;  %v532_v12 = vld [vmem:[%s234_s26 + $0x10] sm:$0xff]  ;;  %v270_v13 = vld [vmem:[%s794_s2 + $0x18] sm:$0xff]  ;;  %v268_v14 = vld [vmem:[%s794_s2 + $0x8] sm:$0xff]  ;;  %s367_s10 = sadd.s32 (%p722_p6), %s635_s14, %s524_s9 }
  0x2c   : > { %283 = vperm.xlu1 %596, %v269_v8   ;;  %273 = vperm.xlu0 %595, %v267_v10   ;;  %v531_v15 = vld [vmem:[%s234_s26 + $0x8] sm:$0xff]  ;;  %v530_v16 = vld [vmem:[%s234_s26] sm:$0xff]  ;;  %s525_s11 = sshll.u32 (%p722_p6), %s367_s10, 3 }
  0x2d   : > { %336 = vmatpush.bf16.msra.mxu0 %v533_v11  ;;  %534 = vmatpush.bf16.msra.mxu1 %v533_v11  ;;  %v528_v17 = vld [vmem:[%s793_s1] sm:$0xff]  ;;  %v529_v18 = vld [vmem:[%s793_s1 + $0x8] sm:$0xff]  ;;  %s369_s24 = scalar_lea.vmem (%p722_p6), %s795_s3, %s525_s11 }
  0x31   : > { %337 = vmatpush.bf16.msra.mxu0 %v532_v12  ;;  %535 = vmatpush.bf16.msra.mxu1 %v532_v12 }
  0x34   : > { %288 = vperm.xlu1 %596, %v270_v13   ;;  %278 = vperm.xlu0 %595, %v268_v14  }
  0x35   : > { %338 = vmatpush.bf16.msra.mxu0 %v531_v15  ;;  %536 = vmatpush.bf16.msra.mxu1 %v531_v15 }
  0x39   : > { %339 = vmatpush.bf16.msra.mxu0 %v530_v16  ;;  %537 = vmatpush.bf16.msra.mxu1 %v530_v16 }
  0x3c   : > { %521 = vmatmul.msk.bf16.vlgmr.msra.gmra.mxu0 %vm325_vm0, %v528_v17  ;;  %522 = vmatmul.msk.bf16.vlgmr.msra.gmra.mxu1 %vm325_vm0, %v529_v18 }
  0x9e   : > { %v284_v19 = vpop.permute.xlu1 %283  ;;  %v274_v20 = vpop.permute.xlu0 %273 }
  0xa6   : > { %v289_v27 = vpop.permute.xlu1 %288  ;;  %v279_v28 = vpop.permute.xlu0 %278 }
  0xb9   : > { %v341_v21 = vpop.f32.mrf.mxu0  ;;  %v346_v22 = vpop.f32.mrf.mxu1 }
  0xba   : > { %v342_v23 = vadd.f32 %v341_v21, %v274_v20  ;;  %v347_v24 = vadd.f32 %v346_v22, %v284_v19 }
  0xbc   : > { %v351_v25 = vmax.f32 %v342_v23, 0.0  ;;  %v353_v26 = vmax.f32 %v347_v24, 0.0 }
  0xbe   : > { %355 = vst [vmem:[%s253_s8] sm:$0xff] %v351_v25 }
  0xbf   : > { %357 = vst [vmem:[%s253_s8 + $0x10] sm:$0xff] %v353_v26 }
  0xc1   : > { %v343_v29 = vpop.f32.mrf.mxu0  ;;  %v348_v30 = vpop.f32.mrf.mxu1 }
  0xc2   : > { %v344_v31 = vadd.f32 %v343_v29, %v279_v28  ;;  %v349_v32 = vadd.f32 %v348_v30, %v289_v27 }
  0xc3   : > { %365 = sbr.rel (!%p722_p6) target bundleno = 208 (0xd0), region = 77 }
  0xc4   : > { %v352_v33 = vmax.f32 %v344_v31, 0.0  ;;  %v354_v34 = vmax.f32 %v349_v32, 0.0 }
  0xc5   : > { %v404_v35 = vld [vmem:[%s253_s8] sm:$0xff] (%p722_p6) }
  0xc6   : > { %356 = vst [vmem:[%s253_s8 + $0x8] sm:$0xff] %v352_v33  ;;  %v408_v37 = vld [vmem:[%s253_s8 + $0x10] sm:$0xff] (%p722_p6) }
  0xc7   : > { %358 = vst [vmem:[%s253_s8 + $0x18] sm:$0xff] %v354_v34 }
  0xc8   : > { %405 = vst [vmem:[%s369_s24] sm:$0xff] %v404_v35 }
  0xc9   : > { %409 = vst [vmem:[%s369_s24 + $0x20] sm:$0xff] %v408_v37 }
  0xcd   : > { %v406_v36 = vld [vmem:[%s253_s8 + $0x8] sm:$0xff] }
  0xce   : > { %v410_v38 = vld [vmem:[%s253_s8 + $0x18] sm:$0xff]  ;;  %407 = vst [vmem:[%s369_s24 + $0x10] sm:$0xff] %v406_v36 }
  0xcf   : > { %411 = vst [vmem:[%s369_s24 + $0x30] sm:$0xff] %v410_v38 }
  0xd0 PF: > { %s13_s18 = sadd.s32 1, %s651_s18   ;;  %s797_s12 = smov %s631_s13 }
  0xd1   : > { %p10_p12 = scmp.ge.s32.totalorder %s13_s18, 6   ;;  %s798_s13 = smov %s730_s27 }
  0xd2   : > { %s799_s14 = smov %s643_s16  ;;  %s800_s15 = smov %s647_s17 }
  0xd3   : > { %s801_s16 = smov %s804_s19  ;;  %s802_s17 = smov %s808_s20 }
  0xd4   :  { %12 = sbr.rel (!%p10_p12) target bundleno = 4 (0x4), region = 146 }

// kernel: _fwd.3
= control target key start
LH: loop header
LB: loop body
LE: loop exit
PB: predicated region body
PF: predicated region fallthrough
CT: control target
= control target key end

     0   :  { %s2072_s12 = smov 0   ;;  %s2074_s13 = smov 0   ;;  %s2369_s0 = inlined_call_operand.vmem [shape: bf16[2,1440,8], index: 0, kind: input, shape index: {}]   ;;  %s2370_s1 = inlined_call_operand.vmem [shape: bf16[32,1440], index: 1, kind: input, shape index: {}]   ;;  %s2371_s2 = inlined_call_operand.vmem [shape: f32[32,1], index: 2, kind: input, shape index: {}]   ;;  %s2372_s3 = inlined_call_operand.vmem [shape: f32[2,32,8], index: 3, kind: output, shape index: {}]  }
   0x1   :  { %s2076_s14 = smov 0  }
   0x2 LB: > { %s25_s15 = sadd.s32 1, %s2045_s13  ;;  %p1420_p0 = scmp.ge.s32.totalorder %s2049_s14, 1  ;;  %s2049_s14 = sphi %s2076_s14, %s13_s14   ;;  %s2045_s13 = sphi %s2074_s13, %s2374_s13   ;;  %s2041_s12 = sphi %s2072_s12, %s2373_s12  }
   0x3   : > { %p27_p1 = scmp.ge.s32.totalorder %s25_s15, 2  ;;  %p156_p2 = scmp.lt.s32.totalorder %s2049_s14, 3 }
   0x5   : > { %s2376_s15 = smov (%p27_p1, %s25_s15), 0  ;;  %p157_p3 = pnand %p1420_p0, %p156_p2 }
   0x6   : > { %p186_p4 = scmp.lt.s32.totalorder (!%p157_p3), %s2041_s12, 1 }
   0x7   : > { %160 = sbr.rel (%p157_p3) target bundleno = 277 (0x115), region = 32 }
   0xc   : > { %s2378_s12 = smov (!%p186_p4, %s2041_s12), 1  ;;  %v2051_v16 = vmov 0   ;;  %v407_v21 = vld [vmem:[%s2371_s2] sm:$0xff]  ;;  %v408_v28 = vld [vmem:[%s2371_s2 + $0x8] sm:$0xff]  ;;  %v1891_v33 = vld [vmem:[%s2370_s1 + $0x2c] sm:$0xf0] }
   0xd   : > { %s1999_s16 = smul.u32 720, %s2378_s12  ;;  %2025 = vset.pattern.permute.xlu0 %v2051_v16  ;;  %2026 = vset.pattern.permute.xlu1 %v2051_v16  ;;  %v1426_v32 = vld [vmem:[%s2370_s1] sm:$0xf]  ;;  %v1885_v34 = vld [vmem:[%s2370_s1 + $0x4] sm:$0xf]  ;;  %v409_v43 = vld [vmem:[%s2371_s2 + $0x10] sm:$0xff] }
   0xe   : > { %413 = vperm.xlu0 %2025, %v407_v21   ;;  %v1428_v38 = vld [vmem:[%s2370_s1 + $0x30] sm:$0xf0]  ;;  %v1434_v39 = vld [vmem:[%s2370_s1 + $0x8] sm:$0xf]  ;;  %v1892_v40 = vld [vmem:[%s2370_s1 + $0x34] sm:$0xf0]  ;;  %423 = vperm.xlu1 %2026, %v409_v43   ;;  %v1427_v46 = vor.u32 %v1891_v33, %v1426_v32 }
   0xf   : > { %s2096_s19 = scalar_lea.vmem %s2369_s0, %s1999_s16  ;;  %v1886_v41 = vld [vmem:[%s2370_s1 + $0xc] sm:$0xf]  ;;  %v1436_v42 = vld [vmem:[%s2370_s1 + $0x38] sm:$0xf0]  ;;  %v1431_v47 = vor.u32 %v1885_v34, %v1428_v38  ;;  %v1435_v48 = vor.u32 %v1892_v40, %v1434_v39  ;;  %v1893_v32 = vld [vmem:[%s2370_s1 + $0x3c] sm:$0xf0] }
  0x10   : > { %v1916_v0 = vld [vmem:[%s2096_s19 + $0x38] sm:$0xff]  ;;  %v1915_v4 = vld [vmem:[%s2096_s19 + $0x30] sm:$0xff]  ;;  %v1914_v8 = vld [vmem:[%s2096_s19 + $0x28] sm:$0xff]  ;;  %v1439_v49 = vor.u32 %v1886_v41, %v1436_v42  ;;  %vm1089_vm0 = vcmask 261120   ;;  %vm1328_vm1 = vcmask 64512  }
  0x11   : > { %v1924_v1 = vld [vmem:[%s2096_s19 + $0x78] sm:$0xff]  ;;  %1096 = vmatpush.bf16.msra.mxu0 %v1916_v0  ;;  %v1923_v5 = vld [vmem:[%s2096_s19 + $0x70] sm:$0xff]  ;;  %v1922_v9 = vld [vmem:[%s2096_s19 + $0x68] sm:$0xff] }
  0x12   : > { %v1932_v2 = vld [vmem:[%s2096_s19 + $0xb8] sm:$0xff]  ;;  %1115 = vmatpush.bf16.msra.mxu1 %v1924_v1  ;;  %v1931_v6 = vld [vmem:[%s2096_s19 + $0xb0] sm:$0xff]  ;;  %v1930_v10 = vld [vmem:[%s2096_s19 + $0xa8] sm:$0xff] }
  0x13   : > { %v1940_v3 = vld [vmem:[%s2096_s19 + $0xf8] sm:$0xff]  ;;  %1134 = vmatpush.bf16.msra.mxu2 %v1932_v2  ;;  %v1939_v7 = vld [vmem:[%s2096_s19 + $0xf0] sm:$0xff]  ;;  %v1938_v11 = vld [vmem:[%s2096_s19 + $0xe8] sm:$0xff] }
  0x14   : > { %1153 = vmatpush.bf16.msra.mxu3 %v1940_v3  ;;  %v1913_v12 = vld [vmem:[%s2096_s19 + $0x20] sm:$0xff]  ;;  %v1912_v17 = vld [vmem:[%s2096_s19 + $0x18] sm:$0xff]  ;;  %v1911_v22 = vld [vmem:[%s2096_s19 + $0x10] sm:$0xff] }
  0x15   : > { %1097 = vmatpush.bf16.msra.mxu0 %v1915_v4  ;;  %v1921_v13 = vld [vmem:[%s2096_s19 + $0x60] sm:$0xff]  ;;  %v1920_v18 = vld [vmem:[%s2096_s19 + $0x58] sm:$0xff]  ;;  %v1919_v23 = vld [vmem:[%s2096_s19 + $0x50] sm:$0xff] }
  0x16   : > { %1116 = vmatpush.bf16.msra.mxu1 %v1923_v5  ;;  %v1929_v14 = vld [vmem:[%s2096_s19 + $0xa0] sm:$0xff]  ;;  %v1928_v19 = vld [vmem:[%s2096_s19 + $0x98] sm:$0xff]  ;;  %v1927_v24 = vld [vmem:[%s2096_s19 + $0x90] sm:$0xff]  ;;  %418 = vperm.xlu0 %2025, %v408_v28  }
  0x17   : > { %1135 = vmatpush.bf16.msra.mxu2 %v1931_v6  ;;  %v1937_v15 = vld [vmem:[%s2096_s19 + $0xe0] sm:$0xff]  ;;  %v1936_v20 = vld [vmem:[%s2096_s19 + $0xd8] sm:$0xff]  ;;  %v1935_v25 = vld [vmem:[%s2096_s19 + $0xd0] sm:$0xff] }
  0x18   : > { %1154 = vmatpush.bf16.msra.mxu3 %v1939_v7  ;;  %v1910_v26 = vld [vmem:[%s2096_s19 + $0x8] sm:$0xff]  ;;  %v1909_v31 = vld [vmem:[%s2096_s19] sm:$0xff]  ;;  %v1964_v44 = vld [vmem:[%s2096_s19 + $0x1b8] sm:$0xff] }
  0x19   : > { %1098 = vmatpush.bf16.msra.mxu0 %v1914_v8  ;;  %v1918_v27 = vld [vmem:[%s2096_s19 + $0x48] sm:$0xff]  ;;  %v1917_v35 = vld [vmem:[%s2096_s19 + $0x40] sm:$0xff]  ;;  %v1948_v45 = vld [vmem:[%s2096_s19 + $0x138] sm:$0xff] }
  0x1a   : > { %1117 = vmatpush.bf16.msra.mxu1 %v1922_v9  ;;  %v1926_v29 = vld [vmem:[%s2096_s19 + $0x88] sm:$0xff]  ;;  %v1925_v36 = vld [vmem:[%s2096_s19 + $0x80] sm:$0xff]  ;;  %v1956_v50 = vld [vmem:[%s2096_s19 + $0x178] sm:$0xff] }
  0x1b   : > { %1136 = vmatpush.bf16.msra.mxu2 %v1930_v10  ;;  %v1934_v30 = vld [vmem:[%s2096_s19 + $0xc8] sm:$0xff]  ;;  %v1933_v37 = vld [vmem:[%s2096_s19 + $0xc0] sm:$0xff]  ;;  %v1972_v51 = vld [vmem:[%s2096_s19 + $0x1f8] sm:$0xff] }
  0x1c   : > { %1155 = vmatpush.bf16.msra.mxu3 %v1938_v11  ;;  %v1963_v52 = vld [vmem:[%s2096_s19 + $0x1b0] sm:$0xff]  ;;  %v410_v56 = vld [vmem:[%s2371_s2 + $0x18] sm:$0xff]  ;;  %v1962_v57 = vld [vmem:[%s2096_s19 + $0x1a8] sm:$0xff] }
  0x1d   : > { %1099 = vmatpush.bf16.msra.mxu0 %v1913_v12  ;;  %v1947_v53 = vld [vmem:[%s2096_s19 + $0x130] sm:$0xff]  ;;  %v1946_v58 = vld [vmem:[%s2096_s19 + $0x128] sm:$0xff]  ;;  %428 = vperm.xlu1 %2026, %v410_v56   ;;  %v1961_v61 = vld [vmem:[%s2096_s19 + $0x1a0] sm:$0xff] }
  0x1e   : > { %1118 = vmatpush.bf16.msra.mxu1 %v1921_v13  ;;  %v1955_v54 = vld [vmem:[%s2096_s19 + $0x170] sm:$0xff]  ;;  %v1954_v59 = vld [vmem:[%s2096_s19 + $0x168] sm:$0xff]  ;;  %v1945_v62 = vld [vmem:[%s2096_s19 + $0x120] sm:$0xff] }
  0x1f   : > { %1137 = vmatpush.bf16.msra.mxu2 %v1929_v14  ;;  %v1971_v55 = vld [vmem:[%s2096_s19 + $0x1f0] sm:$0xff]  ;;  %v1970_v60 = vld [vmem:[%s2096_s19 + $0x1e8] sm:$0xff]  ;;  %v1953_v63 = vld [vmem:[%s2096_s19 + $0x160] sm:$0xff] }
  0x20   : > { %1156 = vmatpush.bf16.msra.mxu3 %v1937_v15  ;;  %v1969_v0 = vld [vmem:[%s2096_s19 + $0x1e0] sm:$0xff]  ;;  %v1903_v2 = vld [vmem:[%s2370_s1 + $0x8c] sm:$0xf0]  ;;  %v1476_v4 = vld [vmem:[%s2370_s1 + $0x90] sm:$0xf0] }
  0x21   : > { %1100 = vmatpush.bf16.msra.mxu0 %v1912_v17  ;;  %v1474_v1 = vld [vmem:[%s2370_s1 + $0x60] sm:$0xf]  ;;  %v1897_v3 = vld [vmem:[%s2370_s1 + $0x64] sm:$0xf]  ;;  %v1482_v5 = vld [vmem:[%s2370_s1 + $0x68] sm:$0xf] }
  0x22   : > { %1119 = vmatpush.bf16.msra.mxu1 %v1920_v18  ;;  %v1904_v6 = vld [vmem:[%s2370_s1 + $0x94] sm:$0xf0]  ;;  %v1898_v7 = vld [vmem:[%s2370_s1 + $0x6c] sm:$0xf]  ;;  %v1484_v8 = vld [vmem:[%s2370_s1 + $0x98] sm:$0xf0]  ;;  %v1475_v11 = vor.u32 %v1903_v2, %v1474_v1  ;;  %v1479_v12 = vor.u32 %v1897_v3, %v1476_v4 }
  0x23   : > { %1138 = vmatpush.bf16.msra.mxu2 %v1928_v19  ;;  %v1960_v9 = vld [vmem:[%s2096_s19 + $0x198] sm:$0xff]  ;;  %v1483_v13 = vor.u32 %v1904_v6, %v1482_v5  ;;  %v1487_v14 = vor.u32 %v1898_v7, %v1484_v8  ;;  %v1959_v17 = vld [vmem:[%s2096_s19 + $0x190] sm:$0xff]  ;;  %v1958_v21 = vld [vmem:[%s2096_s19 + $0x188] sm:$0xff] }
  0x24   : > { %1157 = vmatpush.bf16.msra.mxu3 %v1936_v20  ;;  %v1944_v10 = vld [vmem:[%s2096_s19 + $0x118] sm:$0xff]  ;;  %v1943_v18 = vld [vmem:[%s2096_s19 + $0x110] sm:$0xff]  ;;  %v1965_v28 = vld [vmem:[%s2096_s19 + $0x1c0] sm:$0xff] }
  0x25   : > { %1101 = vmatpush.bf16.msra.mxu0 %v1911_v22  ;;  %v1952_v15 = vld [vmem:[%s2096_s19 + $0x158] sm:$0xff]  ;;  %v1951_v19 = vld [vmem:[%s2096_s19 + $0x150] sm:$0xff]  ;;  %v1942_v22 = vld [vmem:[%s2096_s19 + $0x108] sm:$0xff] }
  0x26   : > { %1120 = vmatpush.bf16.msra.mxu1 %v1919_v23  ;;  %v1968_v16 = vld [vmem:[%s2096_s19 + $0x1d8] sm:$0xff]  ;;  %v1967_v20 = vld [vmem:[%s2096_s19 + $0x1d0] sm:$0xff]  ;;  %v1950_v23 = vld [vmem:[%s2096_s19 + $0x148] sm:$0xff] }
  0x27   : > { %1139 = vmatpush.bf16.msra.mxu2 %v1927_v24  ;;  %v1966_v24 = vld [vmem:[%s2096_s19 + $0x1c8] sm:$0xff]  ;;  %v1887_v33 = vld [vmem:[%s2370_s1 + $0x14] sm:$0xf]  ;;  %v1444_v34 = vld [vmem:[%s2370_s1 + $0x40] sm:$0xf0] }
  0x28   : > { %1158 = vmatpush.bf16.msra.mxu3 %v1935_v25  ;;  %v1957_v25 = vld [vmem:[%s2096_s19 + $0x180] sm:$0xff]  ;;  %v1452_v38 = vld [vmem:[%s2370_s1 + $0x48] sm:$0xf0]  ;;  %v1988_v39 = vld [vmem:[%s2096_s19 + $0x278] sm:$0xff]  ;;  %v1447_v43 = vor.u32 %v1887_v33, %v1444_v34 }
  0x29   : > { %1102 = vmatpush.bf16.msra.mxu0 %v1910_v26  ;;  %v1941_v26 = vld [vmem:[%s2096_s19 + $0x100] sm:$0xff]  ;;  %v1998_v40 = vld [vmem:[%s2096_s19 + $0x2c8] sm:$0xff]  ;;  %v1995_v42 = vld [vmem:[%s2096_s19 + $0x2b0] sm:$0xff] }
  0x2a   : > { %1121 = vmatpush.bf16.msra.mxu1 %v1918_v27  ;;  %v1949_v27 = vld [vmem:[%s2096_s19 + $0x140] sm:$0xff]  ;;  %v1992_v56 = vld [vmem:[%s2096_s19 + $0x298] sm:$0xff]  ;;  %v1991_v3 = vld [vmem:[%s2096_s19 + $0x290] sm:$0xff] }
  0x2b   : > { %1140 = vmatpush.bf16.msra.mxu2 %v1926_v29  ;;  %v1442_v29 = vld [vmem:[%s2370_s1 + $0x10] sm:$0xf]  ;;  %v1984_v1 = vld [vmem:[%s2096_s19 + $0x258] sm:$0xff]  ;;  %v1902_v33 = vld [vmem:[%s2370_s1 + $0x8c] sm:$0xf] }
  0x2c   : > { %1159 = vmatpush.bf16.msra.mxu3 %v1934_v30  ;;  %v1996_v30 = vld [vmem:[%s2096_s19 + $0x2b8] sm:$0xff]  ;;  %v1443_v41 = vor.u32 %v1893_v32, %v1442_v29  ;;  %v1975_v7 = vld [vmem:[%s2096_s19 + $0x210] sm:$0xff]  ;;  %v1901_v29 = vld [vmem:[%s2370_s1 + $0x84] sm:$0xf] }
  0x2d   : > { %1103 = vmatpush.bf16.msra.mxu0 %v1909_v31  ;;  %v1980_v31 = vld [vmem:[%s2096_s19 + $0x238] sm:$0xff]  ;;  %v1983_v8 = vld [vmem:[%s2096_s19 + $0x250] sm:$0xff] }
  0x2e   : > { %1122 = vmatpush.bf16.msra.mxu1 %v1917_v35  ;;  %v1450_v35 = vld [vmem:[%s2370_s1 + $0x18] sm:$0xf]  ;;  %v1516_v34 = vld [vmem:[%s2370_s1 + $0xb8] sm:$0xf0] }
  0x2f   : > { %1141 = vmatpush.bf16.msra.mxu2 %v1925_v36  ;;  %v1894_v36 = vld [vmem:[%s2370_s1 + $0x44] sm:$0xf0]  ;;  %v1908_v32 = vld [vmem:[%s2370_s1 + $0xb4] sm:$0xf0] }
  0x30   : > { %1160 = vmatpush.bf16.msra.mxu3 %v1933_v37  ;;  %1104 = vmatmul.bf16.vlgmr.msra.gmra.mxu0 %v1427_v46  ;;  %v1888_v37 = vld [vmem:[%s2370_s1 + $0x1c] sm:$0xf]  ;;  %v1979_v46 = vld [vmem:[%s2096_s19 + $0x230] sm:$0xff] }
  0x31   : > { %1172 = vmatpush.bf16.msrb.mxu0 %v1948_v45  ;;  %1123 = vmatmul.bf16.vlgmr.msra.gmra.mxu1 %v1431_v47  ;;  %v1455_v45 = vor.u32 %v1888_v37, %v1452_v38  ;;  %v1987_v47 = vld [vmem:[%s2096_s19 + $0x270] sm:$0xff]  ;;  %v1519_v38 = vor.u32 %v1902_v33, %v1516_v34 }
  0x32   : > { %1142 = vmatmul.bf16.vlgmr.msra.gmra.mxu2 %v1435_v48  ;;  %1191 = vmatpush.bf16.msrb.mxu1 %v1956_v50  ;;  %v1997_v48 = vld [vmem:[%s2096_s19 + $0x2c0] sm:$0xff]  ;;  %v1978_v50 = vld [vmem:[%s2096_s19 + $0x228] sm:$0xff] }
  0x33   : > { %1210 = vmatpush.bf16.msrb.mxu2 %v1964_v44  ;;  %1161 = vmatmul.bf16.vlgmr.msra.gmra.mxu3 %v1439_v49  ;;  %v1451_v44 = vor.u32 %v1894_v36, %v1450_v35  ;;  %v1994_v49 = vld [vmem:[%s2096_s19 + $0x2a8] sm:$0xff] }
  0x34   : > { %1229 = vmatpush.bf16.msrb.mxu3 %v1972_v51  ;;  %v1986_v51 = vld [vmem:[%s2096_s19 + $0x268] sm:$0xff] }
  0x35   : > { %1173 = vmatpush.bf16.msrb.mxu0 %v1947_v53  ;;  %v1977_v53 = vld [vmem:[%s2096_s19 + $0x220] sm:$0xff] }
  0x36   : > { %1192 = vmatpush.bf16.msrb.mxu1 %v1955_v54  ;;  %v1985_v54 = vld [vmem:[%s2096_s19 + $0x260] sm:$0xff] }
  0x37   : > { %1211 = vmatpush.bf16.msrb.mxu2 %v1963_v52  ;;  %v1993_v52 = vld [vmem:[%s2096_s19 + $0x2a0] sm:$0xff] }
  0x38   : > { %1230 = vmatpush.bf16.msrb.mxu3 %v1971_v55  ;;  %v1490_v55 = vld [vmem:[%s2370_s1 + $0x70] sm:$0xf] }
  0x39   : > { %1174 = vmatpush.bf16.msrb.mxu0 %v1946_v58  ;;  %v1899_v58 = vld [vmem:[%s2370_s1 + $0x74] sm:$0xf] }
  0x3a   : > { %1193 = vmatpush.bf16.msrb.mxu1 %v1954_v59  ;;  %v1492_v59 = vld [vmem:[%s2370_s1 + $0xa0] sm:$0xf0] }
  0x3b   : > { %1212 = vmatpush.bf16.msrb.mxu2 %v1962_v57  ;;  %v1905_v57 = vld [vmem:[%s2370_s1 + $0x9c] sm:$0xf0]  ;;  %v1495_v4 = vor.u32 %v1899_v58, %v1492_v59 }
  0x3c   : > { %1231 = vmatpush.bf16.msrb.mxu3 %v1970_v60  ;;  %v1498_v60 = vld [vmem:[%s2370_s1 + $0x78] sm:$0xf]  ;;  %v1491_v2 = vor.u32 %v1905_v57, %v1490_v55 }
  0x3d   : > { %1175 = vmatpush.bf16.msrb.mxu0 %v1945_v62  ;;  %v1976_v62 = vld [vmem:[%s2096_s19 + $0x218] sm:$0xff] }
  0x3e   : > { %1194 = vmatpush.bf16.msrb.mxu1 %v1953_v63  ;;  %v1900_v63 = vld [vmem:[%s2370_s1 + $0x7c] sm:$0xf] }
  0x3f   : > { %1213 = vmatpush.bf16.msrb.mxu2 %v1961_v61  ;;  %v1906_v61 = vld [vmem:[%s2370_s1 + $0xa4] sm:$0xf0] }
  0x40   : > { %1232 = vmatpush.bf16.msrb.mxu3 %v1969_v0  ;;  %1109 = vmatmul.bf16.gmra.mxu0 %v1475_v11  ;;  %v1500_v0 = vld [vmem:[%s2370_s1 + $0xa8] sm:$0xf0]  ;;  %v1499_v5 = vor.u32 %v1906_v61, %v1498_v60 }
  0x41   : > { %1176 = vmatpush.bf16.msrb.mxu0 %v1944_v10  ;;  %1128 = vmatmul.bf16.gmra.mxu1 %v1479_v12  ;;  %v1503_v6 = vor.u32 %v1900_v63, %v1500_v0  ;;  %v1974_v10 = vld [vmem:[%s2096_s19 + $0x208] sm:$0xff]  ;;  %v1989_v12 = vld [vmem:[%s2096_s19 + $0x280] sm:$0xff] }
  0x42   : > { %1147 = vmatmul.bf16.gmra.mxu2 %v1483_v13  ;;  %1195 = vmatpush.bf16.msrb.mxu1 %v1952_v15  ;;  %v1982_v11 = vld [vmem:[%s2096_s19 + $0x248] sm:$0xff]  ;;  %v1973_v13 = vld [vmem:[%s2096_s19 + $0x200] sm:$0xff] }
  0x43   : > { %1214 = vmatpush.bf16.msrb.mxu2 %v1960_v9  ;;  %1166 = vmatmul.bf16.gmra.mxu3 %v1487_v14  ;;  %v1990_v9 = vld [vmem:[%s2096_s19 + $0x288] sm:$0xff]  ;;  %v1981_v14 = vld [vmem:[%s2096_s19 + $0x240] sm:$0xff]  ;;  %s1884_s19 = sshll.u32 %s2378_s12, 5 }
  0x44   : > { %1233 = vmatpush.bf16.msrb.mxu3 %v1968_v16  ;;  %v1458_v15 = vld [vmem:[%s2370_s1 + $0x20] sm:$0xf]  ;;  %v1895_v16 = vld [vmem:[%s2370_s1 + $0x4c] sm:$0xf0]  ;;  %s2350_s10 = scalar_lea.vmem %s2372_s3, %s1884_s19 }
  0x45   : > { %1177 = vmatpush.bf16.msrb.mxu0 %v1943_v18  ;;  %v1460_v18 = vld [vmem:[%s2370_s1 + $0x50] sm:$0xf0] }
  0x46   : > { %1196 = vmatpush.bf16.msrb.mxu1 %v1951_v19  ;;  %v1466_v19 = vld [vmem:[%s2370_s1 + $0x28] sm:$0xf] }
  0x47   : > { %1215 = vmatpush.bf16.msrb.mxu2 %v1959_v17  ;;  %v1889_v17 = vld [vmem:[%s2370_s1 + $0x24] sm:$0xf] }
  0x48   : > { %1234 = vmatpush.bf16.msrb.mxu3 %v1967_v20  ;;  %v1896_v20 = vld [vmem:[%s2370_s1 + $0x54] sm:$0xf0] }
  0x49   : > { %1178 = vmatpush.bf16.msrb.mxu0 %v1942_v22  ;;  %v1468_v22 = vld [vmem:[%s2370_s1 + $0x58] sm:$0xf0] }
  0x4a   : > { %1197 = vmatpush.bf16.msrb.mxu1 %v1950_v23  ;;  %v1459_v23 = vor.u32 %v1895_v16, %v1458_v15 }
  0x4b   : > { %1216 = vmatpush.bf16.msrb.mxu2 %v1958_v21  ;;  %v1890_v21 = vld [vmem:[%s2370_s1 + $0x2c] sm:$0xf] }
  0x4c   : > { %1235 = vmatpush.bf16.msrb.mxu3 %v1966_v24  ;;  %v1463_v24 = vor.u32 %v1889_v17, %v1460_v18 }
  0x4d   : > { %1179 = vmatpush.bf16.msrb.mxu0 %v1941_v26  ;;  %v1471_v26 = vor.u32 %v1890_v21, %v1468_v22 }
  0x4e   : > { %1198 = vmatpush.bf16.msrb.mxu1 %v1949_v27  ;;  %v1506_v27 = vld [vmem:[%s2370_s1 + $0x80] sm:$0xf] }
  0x4f   : > { %1217 = vmatpush.bf16.msrb.mxu2 %v1957_v25  ;;  %v1467_v25 = vor.u32 %v1896_v20, %v1466_v19 }
  0x50   : > { %1236 = vmatpush.bf16.msrb.mxu3 %v1965_v28  ;;  %1180 = vmatmul.bf16.vlgmr.msrb.gmra.mxu0 %v1443_v41  ;;  %v1907_v28 = vld [vmem:[%s2370_s1 + $0xac] sm:$0xf0] }
  0x51   : > { %1248 = vmatpush.bf16.msra.mxu0 %v1980_v31  ;;  %1199 = vmatmul.bf16.vlgmr.msrb.gmra.mxu1 %v1447_v43  ;;  %v1514_v31 = vld [vmem:[%s2370_s1 + $0x88] sm:$0xf]  ;;  %v1507_v35 = vor.u32 %v1907_v28, %v1506_v27 }
  0x52   : > { %1267 = vmatpush.bf16.msra.mxu1 %v1988_v39  ;;  %1218 = vmatmul.bf16.vlgmr.msrb.gmra.mxu2 %v1451_v44  ;;  %v1515_v37 = vor.u32 %v1908_v32, %v1514_v31 }
  0x53   : > { %1286 = vmatpush.bf16.msra.mxu2 %v1996_v30  ;;  %1237 = vmatmul.bf16.vlgmr.msrb.gmra.mxu3 %v1455_v45  ;;  %v1508_v30 = vld [vmem:[%s2370_s1 + $0xb0] sm:$0xf0] }
  0x54   : > { %1311 = vmatpush.bf16.msra.mxu3 %v1998_v40  ;;  %v1511_v36 = vor.u32 %v1901_v29, %v1508_v30 }
  0x55   : > { %1249 = vmatpush.bf16.msra.mxu0 %v1979_v46 }
  0x56   : > { %1268 = vmatpush.bf16.msra.mxu1 %v1987_v47 }
  0x57   : > { %1287 = vmatpush.bf16.msra.mxu2 %v1995_v42 }
  0x58   : > { %1312 = vmatpush.bf16.msra.mxu3 %v1997_v48 }
  0x59   : > { %1250 = vmatpush.bf16.msra.mxu0 %v1978_v50 }
  0x5a   : > { %1269 = vmatpush.bf16.msra.mxu1 %v1986_v51 }
  0x5b   : > { %1288 = vmatpush.bf16.msra.mxu2 %v1994_v49 }
  0x5d   : > { %1251 = vmatpush.bf16.msra.mxu0 %v1977_v53 }
  0x5e   : > { %1270 = vmatpush.bf16.msra.mxu1 %v1985_v54 }
  0x5f   : > { %1289 = vmatpush.bf16.msra.mxu2 %v1993_v52 }
  0x60   : > { %1185 = vmatmul.bf16.gmra.mxu0 %v1491_v2 }
  0x61   : > { %1252 = vmatpush.bf16.msra.mxu0 %v1976_v62  ;;  %1204 = vmatmul.bf16.gmra.mxu1 %v1495_v4 }
  0x62   : > { %1271 = vmatpush.bf16.msra.mxu1 %v1984_v1  ;;  %1223 = vmatmul.bf16.gmra.mxu2 %v1499_v5 }
  0x63   : > { %1290 = vmatpush.bf16.msra.mxu2 %v1992_v56  ;;  %1242 = vmatmul.bf16.gmra.mxu3 %v1503_v6 }
  0x65   : > { %1253 = vmatpush.bf16.msra.mxu0 %v1975_v7 }
  0x66   : > { %1272 = vmatpush.bf16.msra.mxu1 %v1983_v8 }
  0x67   : > { %1291 = vmatpush.bf16.msra.mxu2 %v1991_v3 }
  0x69   : > { %1254 = vmatpush.bf16.msra.mxu0 %v1974_v10 }
  0x6a   : > { %1273 = vmatpush.bf16.msra.mxu1 %v1982_v11 }
  0x6b   : > { %1292 = vmatpush.bf16.msra.mxu2 %v1990_v9 }
  0x6d   : > { %1255 = vmatpush.bf16.msra.mxu0 %v1973_v13 }
  0x6e   : > { %1274 = vmatpush.bf16.msra.mxu1 %v1981_v14 }
  0x6f   : > { %1293 = vmatpush.bf16.msra.mxu2 %v1989_v12 }
  0x70   : > { %1256 = vmatmul.bf16.vlgmr.msra.gmra.mxu0 %v1459_v23 }
  0x71   : > { %1275 = vmatmul.bf16.vlgmr.msra.gmra.mxu1 %v1463_v24 }
  0x72   : > { %1294 = vmatmul.bf16.vlgmr.msra.gmra.mxu2 %v1467_v25 }
  0x73   : > { %1880 = vmatmul.msk.bf16.vlgmr.msra.gmra.mxu3 %vm1089_vm0, %v1471_v26 }
  0x80   : > { %1261 = vmatmul.bf16.gmra.mxu0 %v1507_v35  ;;  %v414_v57 = vpop.permute.xlu0 %413  ;;  %v424_v8 = vpop.permute.xlu1 %423 }
  0x81   : > { %1280 = vmatmul.bf16.gmra.mxu1 %v1511_v36 }
  0x82   : > { %1299 = vmatmul.bf16.gmra.mxu2 %v1515_v37 }
  0x83   : > { %1881 = vmatmul.msk.bf16.gmra.mxu3 %vm1089_vm0, %v1519_v38 }
  0x88   : > { %v419_v0 = vpop.permute.xlu0 %418 }
  0x8f   : > { %v429_v22 = vpop.permute.xlu1 %428 }
  0xad   : > { %v1105_v39 = vpop.f32.mrf.mxu0 }
  0xae   : > { %v1124_v40 = vpop.f32.mrf.mxu1  ;;  %v1106_v59 = vadd.f32 %v1105_v39, %v414_v57 }
  0xb0   : > { %v1125_v63 = vadd.f32 %v1124_v40, %v1106_v59 }
  0xb5   : > { %v1143_v41 = vpop.f32.mrf.mxu2  ;;  %v1107_v43 = vpop.f32.mrf.mxu0 }
  0xb6   : > { %v1162_v42 = vpop.f32.mrf.mxu3  ;;  %v1126_v44 = vpop.f32.mrf.mxu1  ;;  %v1144_v2 = vadd.f32 %v1143_v41, %v1125_v63  ;;  %v1108_v6 = vadd.f32 %v1107_v43, %v419_v0 }
  0xb8   : > { %v1163_v7 = vadd.f32 %v1162_v42, %v1144_v2  ;;  %v1127_v9 = vadd.f32 %v1126_v44, %v1108_v6 }
  0xbd   : > { %v1145_v45 = vpop.f32.mrf.mxu2  ;;  %v1110_v47 = vpop.f32.mrf.mxu0 }
  0xbe   : > { %v1164_v46 = vpop.f32.mrf.mxu3  ;;  %v1129_v48 = vpop.f32.mrf.mxu1  ;;  %v1146_v12 = vadd.f32 %v1145_v45, %v1127_v9  ;;  %v1111_v13 = vadd.f32 %v1110_v47, %v424_v8 }
  0xc0   : > { %v1165_v18 = vadd.f32 %v1164_v46, %v1146_v12  ;;  %v1130_v19 = vadd.f32 %v1129_v48, %v1111_v13 }
  0xc5   : > { %v1148_v49 = vpop.f32.mrf.mxu2  ;;  %v1112_v51 = vpop.f32.mrf.mxu0 }
  0xc6   : > { %v1167_v50 = vpop.f32.mrf.mxu3  ;;  %v1131_v52 = vpop.f32.mrf.mxu1  ;;  %v1149_v24 = vadd.f32 %v1148_v49, %v1130_v19  ;;  %v1113_v29 = vadd.f32 %v1112_v51, %v429_v22 }
  0xc8   : > { %v1168_v32 = vadd.f32 %v1167_v50, %v1149_v24  ;;  %v1132_v34 = vadd.f32 %v1131_v52, %v1113_v29 }
  0xcd   : > { %v1150_v53 = vpop.f32.mrf.mxu2  ;;  %v1181_v55 = vpop.f32.mrf.mxu0 }
  0xce   : > { %v1169_v54 = vpop.f32.mrf.mxu3  ;;  %v1200_v56 = vpop.f32.mrf.mxu1  ;;  %v1182_v10 = vadd.f32 %v1181_v55, %v1163_v7  ;;  %v1151_v38 = vadd.f32 %v1150_v53, %v1132_v34 }
  0xd0   : > { %v1201_v17 = vadd.f32 %v1200_v56, %v1182_v10  ;;  %v1170_v47 = vadd.f32 %v1169_v54, %v1151_v38 }
  0xd5   : > { %v1219_v58 = vpop.f32.mrf.mxu2  ;;  %v1183_v61 = vpop.f32.mrf.mxu0 }
  0xd6   : > { %v1238_v60 = vpop.f32.mrf.mxu3  ;;  %v1202_v62 = vpop.f32.mrf.mxu1  ;;  %v1220_v20 = vadd.f32 %v1219_v58, %v1201_v17  ;;  %v1184_v21 = vadd.f32 %v1183_v61, %v1165_v18 }
  0xd8   : > { %v1239_v25 = vadd.f32 %v1238_v60, %v1220_v20  ;;  %v1203_v30 = vadd.f32 %v1202_v62, %v1184_v21 }
  0xdd   : > { %v1221_v1 = vpop.f32.mrf.mxu2  ;;  %v1186_v4 = vpop.f32.mrf.mxu0 }
  0xde   : > { %v1240_v3 = vpop.f32.mrf.mxu3  ;;  %v1205_v5 = vpop.f32.mrf.mxu1  ;;  %v1222_v33 = vadd.f32 %v1221_v1, %v1203_v30  ;;  %v1187_v35 = vadd.f32 %v1186_v4, %v1168_v32 }
  0xe0   : > { %v1241_v39 = vadd.f32 %v1240_v3, %v1222_v33  ;;  %v1206_v44 = vadd.f32 %v1205_v5, %v1187_v35 }
  0xe5   : > { %v1224_v11 = vpop.f32.mrf.mxu2  ;;  %v1188_v15 = vpop.f32.mrf.mxu0 }
  0xe6   : > { %v1243_v14 = vpop.f32.mrf.mxu3  ;;  %v1207_v16 = vpop.f32.mrf.mxu1  ;;  %v1225_v48 = vadd.f32 %v1224_v11, %v1206_v44  ;;  %v1189_v50 = vadd.f32 %v1188_v15, %v1170_v47 }
  0xe8   : > { %v1244_v53 = vadd.f32 %v1243_v14, %v1225_v48  ;;  %v1208_v58 = vadd.f32 %v1207_v16, %v1189_v50 }
  0xed   : > { %v1226_v23 = vpop.f32.mrf.mxu2  ;;  %v1257_v27 = vpop.f32.mrf.mxu0 }
  0xee   : > { %v1245_v26 = vpop.f32.mrf.mxu3  ;;  %v1276_v28 = vpop.f32.mrf.mxu1  ;;  %v1258_v31 = vadd.f32 %v1257_v27, %v1239_v25  ;;  %v1227_v62 = vadd.f32 %v1226_v23, %v1208_v58 }
  0xf0   : > { %v1277_v36 = vadd.f32 %v1276_v28, %v1258_v31  ;;  %v1246_v1 = vadd.f32 %v1245_v26, %v1227_v62 }
  0xf5   : > { %v1295_v37 = vpop.f32.mrf.mxu2  ;;  %v1259_v42 = vpop.f32.mrf.mxu0 }
  0xf6   : > { %v1296_v40 = vadd.f32 %v1295_v37, %v1277_v36  ;;  %v1314_v41 = vpop.f32.mrf.mxu3  ;;  %v1278_v43 = vpop.f32.mrf.mxu1  ;;  %v1260_v46 = vadd.f32 %v1259_v42, %v1241_v39 }
  0xf8   : > { %v1315_v45 = vadd.f32 %v1314_v41, %v1296_v40  ;;  %v1279_v51 = vadd.f32 %v1278_v43, %v1260_v46 }
  0xfa   : > { %v1324_v49 = vmax.f32 %v1315_v45, 0.0 }
  0xfc   : > { %1329 = vst.msk [vmem:[%s2350_s10] sm:$0xff] %vm1328_vm1, %v1324_v49 }
  0xfd   : > { %v1297_v52 = vpop.f32.mrf.mxu2  ;;  %v1262_v57 = vpop.f32.mrf.mxu0 }
  0xfe   : > { %v1298_v55 = vadd.f32 %v1297_v52, %v1279_v51  ;;  %v1316_v56 = vpop.f32.mrf.mxu3  ;;  %v1263_v60 = vadd.f32 %v1262_v57, %v1244_v53  ;;  %v1281_v61 = vpop.f32.mrf.mxu1 }
 0x100   : > { %v1317_v59 = vadd.f32 %v1316_v56, %v1298_v55  ;;  %v1282_v54 = vadd.f32 %v1281_v61, %v1263_v60 }
 0x102   : > { %v1325_v63 = vmax.f32 %v1317_v59, 0.0 }
 0x104   : > { %1330 = vst.msk [vmem:[%s2350_s10 + $0x8] sm:$0xff] %vm1328_vm1, %v1325_v63 }
 0x105   : > { %v1300_v0 = vpop.f32.mrf.mxu2  ;;  %v1264_v4 = vpop.f32.mrf.mxu0 }
 0x106   : > { %v1301_v2 = vadd.f32 %v1300_v0, %v1282_v54  ;;  %v1319_v3 = vpop.f32.mrf.mxu3  ;;  %v1265_v6 = vadd.f32 %v1264_v4, %v1246_v1  ;;  %v1283_v8 = vpop.f32.mrf.mxu1 }
 0x108   : > { %v1320_v5 = vadd.f32 %v1319_v3, %v1301_v2  ;;  %v1284_v9 = vadd.f32 %v1283_v8, %v1265_v6 }
 0x10a   : > { %v1326_v7 = vmax.f32 %v1320_v5, 0.0 }
 0x10c   : > { %1331 = vst.msk [vmem:[%s2350_s10 + $0x10] sm:$0xff] %vm1328_vm1, %v1326_v7 }
 0x10d   : > { %v1302_v10 = vpop.f32.mrf.mxu2 }
 0x10e   : > { %v1303_v11 = vadd.f32 %v1302_v10, %v1284_v9  ;;  %v1321_v12 = vpop.f32.mrf.mxu3 }
 0x110   : > { %v1322_v13 = vadd.f32 %v1321_v12, %v1303_v11 }
 0x112   : > { %v1327_v14 = vmax.f32 %v1322_v13, 0.0 }
 0x114   : > { %1332 = vst.msk [vmem:[%s2350_s10 + $0x18] sm:$0xff] %vm1328_vm1, %v1327_v14 }
 0x115 PF: > { %s13_s14 = sadd.s32 1, %s2049_s14   ;;  %s2373_s12 = smov %s2045_s13 }
 0x116   : > { %p10_p5 = scmp.ge.s32.totalorder %s13_s14, 4   ;;  %s2374_s13 = smov %s2376_s15 }
 0x118   :  { %12 = sbr.rel (!%p10_p5) target bundleno = 2 (0x2), region = 62 }

</bundles_post_ra>
